<compile_context>
chip_gen: v6e
topology: v6e:2x2x1
jax: 0.10.0
libtpu: 0.0.40
codegen_flags: <defaults>
</compile_context>

<pallas_src>
import jax
import jax.numpy as jnp
from jax.experimental import pallas as pl
from jax.experimental.pallas import tpu as pltpu


def mean_mlp_kernel(x_ref, w1_ref, b1_ref, w2_ref, b2_ref, o_ref):
    # x tile: (bb, formula_dim) -- mean over the lane (last) axis, in f32.
    x = x_ref[...].astype(jnp.float32)
    m = jnp.mean(x, axis=-1, keepdims=True)                         # (bb, 1)

    # Linear(1 -> H): outer product == broadcast multiply on the VPU.
    h = m * w1_ref[...].astype(jnp.float32) + b1_ref[...].astype(jnp.float32)
    h = jnp.maximum(h, 0.0)
    # Dropout(p=0.5), eval mode == identity.

    # Linear(H -> H): MXU matmul with f32 accumulation.  If the caller passed W2
    # in bf16 (use_bf16_matmul), h is cast down so the MXU runs bf16 operands.
    y = jnp.dot(h.astype(w2_ref.dtype), w2_ref[...],
                preferred_element_type=jnp.float32)
    y = y + b2_ref[...].astype(jnp.float32)
    y = jnp.maximum(y, 0.0)
    # Dropout(p=0.5), eval mode == identity.

    o_ref[...] = y.astype(o_ref.dtype)


def _round_up(n, m):
    return ((n + m - 1) // m) * m


def _choose_batch_tile(B, block_b, num_cores):
    """Batch tile: as large as possible (multiple of 8), generation-aware split."""
    bb = max(8, min(block_b, _round_up(B, 8)))
    if num_cores > 1 and B >= num_cores * 128:
        # v7x: the 'parallel' grid axis shards across TensorCores.  Keep the step
        # count a multiple of num_cores (balanced work) but never shrink a shard
        # below 128 rows (would underfeed the 256x256 MXU).
        steps = pl.cdiv(B, bb)
        if steps % num_cores != 0:
            target_steps = _round_up(steps, num_cores)
            bb = max(128, _round_up(pl.cdiv(B, target_steps), 8))
    return bb


def mean_mlp_forward(x, w1, b1, w2, b2, *, block_b=2048, num_cores=1,
                     out_dtype=None, use_bf16_matmul=False):
    """x: (B, formula_dim); w1, b1, b2: (1, H); w2: (H, H).  Returns (B, H).

    num_cores: set to 2 on v7x (two TensorCores); leave 1 on v5e/v6e.
    use_bf16_matmul / out_dtype: optional speed path, breaks strict f32 parity.
    """
    B, F = x.shape
    H = w2.shape[1]
    out_dtype = x.dtype if out_dtype is None else jnp.dtype(out_dtype)

    if use_bf16_matmul:
        w2 = w2.astype(jnp.bfloat16)

    bb = _choose_batch_tile(B, block_b, num_cores)
    # Ragged batches: no padding/slicing in the wrapper -- Pallas clips the
    # boundary block's output writeback to the array bounds.
    grid = (pl.cdiv(B, bb),)

    # Double-buffered VMEM footprint estimate; only raise the scoped limit when
    # the default (16 MiB on v5e) would actually bind.
    est_bytes = (2 * bb * (F * x.dtype.itemsize + H * out_dtype.itemsize)
                 + 2 * (H * H * w2.dtype.itemsize + 3 * H * 4))
    vmem_limit = est_bytes + (4 << 20) if est_bytes > (16 << 20) else None

    out = pl.pallas_call(
        mean_mlp_kernel,
        out_shape=jax.ShapeDtypeStruct((B, H), out_dtype),
        grid_spec=pltpu.PrefetchScalarGridSpec(
            num_scalar_prefetch=0,
            grid=grid,
            in_specs=[
                pl.BlockSpec((bb, F), lambda i: (i, 0)),   # x tile over batch
                pl.BlockSpec((1, H), lambda i: (0, 0)),    # W1 (resident)
                pl.BlockSpec((1, H), lambda i: (0, 0)),    # b1 (resident)
                pl.BlockSpec((H, H), lambda i: (0, 0)),    # W2 (resident)
                pl.BlockSpec((1, H), lambda i: (0, 0)),    # b2 (resident)
            ],
            out_specs=pl.BlockSpec((bb, H), lambda i: (i, 0)),  # lane-dense (H % 128 == 0)
        ),
        compiler_params=pltpu.CompilerParams(
            dimension_semantics=("parallel",),
            vmem_limit_bytes=vmem_limit,
        ),
    )(x, w1, b1, w2, b2)
    return out


def init_params(key, hidden_size, dtype=jnp.float32):
    # Mirrors PyTorch nn.Linear default init: uniform(-1/sqrt(fan_in), 1/sqrt(fan_in)).
    k1, k2, k3, k4 = jax.random.split(key, 4)
    bound1 = 1.0                                  # fan_in = 1 for Linear(1, H)
    bound2 = 1.0 / float(hidden_size) ** 0.5      # fan_in = H for Linear(H, H)
    w1 = jax.random.uniform(k1, (1, hidden_size), dtype, -bound1, bound1)
    b1 = jax.random.uniform(k2, (1, hidden_size), dtype, -bound1, bound1)
    w2 = jax.random.uniform(k3, (hidden_size, hidden_size), dtype, -bound2, bound2)
    b2 = jax.random.uniform(k4, (1, hidden_size), dtype, -bound2, bound2)
    return w1, b1, w2, b2


def _reference(x, w1, b1, w2, b2):
    m = jnp.mean(x, axis=-1, keepdims=True)
    h = jnp.maximum(m * w1 + b1, 0.0)
    return jnp.maximum(h @ w2 + b2, 0.0)


if __name__ == "__main__":
    formula_dim = 21     # module default
    hidden_size = 256    # module default (lane-dense output)

    key = jax.random.PRNGKey(0)
    kx1, kx2, kx3, kp = jax.random.split(key, 4)
    w1, b1, w2, b2 = init_params(kp, hidden_size)

    # Case 1: small even batch -> single tile, no boundary block.
    x1 = jax.random.normal(kx1, (64, formula_dim), dtype=jnp.float32)
    out1 = jax.block_until_ready(mean_mlp_forward(x1, w1, b1, w2, b2))
    ref1 = _reference(x1, w1, b1, w2, b2)
    assert out1.shape == (64, hidden_size)
    assert jnp.allclose(out1, ref1, atol=1e-4, rtol=1e-4)

    # Case 2: ragged batch -> boundary block clipped by Pallas (no pad/slice copies).
    x2 = jax.random.normal(kx2, (37, formula_dim), dtype=jnp.float32)
    out2 = jax.block_until_ready(mean_mlp_forward(x2, w1, b1, w2, b2))
    ref2 = _reference(x2, w1, b1, w2, b2)
    assert out2.shape == (37, hidden_size)
    assert jnp.allclose(out2, ref2, atol=1e-4, rtol=1e-4)

    # Case 3: exercise the v7x-style 2-way split (balanced multi-step grid + ragged tail).
    x3 = jax.random.normal(kx3, (300, formula_dim), dtype=jnp.float32)
    out3 = jax.block_until_ready(mean_mlp_forward(x3, w1, b1, w2, b2, num_cores=2))
    ref3 = _reference(x3, w1, b1, w2, b2)
    assert out3.shape == (300, hidden_size)
    assert jnp.allclose(out3, ref3, atol=1e-4, rtol=1e-4)

    print("KERNEL_OK")
</pallas_src>

<mosaic_0001>
module attributes {stable_mosaic.version = 11 : i64} {
  func.func @mean_mlp_kernel(%arg0: i32, %arg1: memref<64x21xf32, #tpu.memory_space<vmem>>, %arg2: memref<1x256xf32, #tpu.memory_space<vmem>>, %arg3: memref<1x256xf32, #tpu.memory_space<vmem>>, %arg4: memref<256x256xf32, #tpu.memory_space<vmem>>, %arg5: memref<1x256xf32, #tpu.memory_space<vmem>>, %arg6: memref<64x256xf32, #tpu.memory_space<vmem>>) attributes {dimension_semantics = [#tpu.dimension_semantics<parallel>], iteration_bounds = array<i64: 1>, scalar_prefetch = 0 : i64, scratch_operands = 0 : i64, tpu.core_type = #tpu.core_type<tc>, window_params = [{transform_indices = @transform_0, window_bounds = array<i64: 64, 21>}, {pipeline_mode = #tpu.pipeline_mode<synchronous>, transform_indices = @transform_1, window_bounds = array<i64: 1, 256>}, {pipeline_mode = #tpu.pipeline_mode<synchronous>, transform_indices = @transform_2, window_bounds = array<i64: 1, 256>}, {pipeline_mode = #tpu.pipeline_mode<synchronous>, transform_indices = @transform_3, window_bounds = array<i64: 256, 256>}, {pipeline_mode = #tpu.pipeline_mode<synchronous>, transform_indices = @transform_4, window_bounds = array<i64: 1, 256>}, {transform_indices = @transform_5, window_bounds = array<i64: 64, 256>}]} {
    %c0 = arith.constant 0 : index
    %c0_0 = arith.constant 0 : index
    %0 = vector.load %arg1[%c0, %c0_0] : memref<64x21xf32, #tpu.memory_space<vmem>>, vector<64x21xf32>
    %cst = arith.constant dense<0.000000e+00> : vector<64xf32>
    %1 = vector.multi_reduction <add>, %0, %cst [1] : vector<64x21xf32> to vector<64xf32>
    %2 = vector.shape_cast %1 : vector<64xf32> to vector<64x1xf32>
    %cst_1 = arith.constant 2.100000e+01 : f32
    %3 = vector.broadcast %cst_1 : f32 to vector<64x1xf32>
    %4 = arith.divf %2, %3 : vector<64x1xf32>
    %c0_2 = arith.constant 0 : index
    %c0_3 = arith.constant 0 : index
    %5 = vector.load %arg2[%c0_2, %c0_3] : memref<1x256xf32, #tpu.memory_space<vmem>>, vector<1x256xf32>
    %6 = vector.broadcast %4 : vector<64x1xf32> to vector<64x256xf32>
    %7 = vector.broadcast %5 : vector<1x256xf32> to vector<64x256xf32>
    %8 = arith.mulf %6, %7 : vector<64x256xf32>
    %c0_4 = arith.constant 0 : index
    %c0_5 = arith.constant 0 : index
    %9 = vector.load %arg3[%c0_4, %c0_5] : memref<1x256xf32, #tpu.memory_space<vmem>>, vector<1x256xf32>
    %10 = vector.broadcast %9 : vector<1x256xf32> to vector<64x256xf32>
    %11 = arith.addf %8, %10 : vector<64x256xf32>
    %cst_6 = arith.constant 0.000000e+00 : f32
    %12 = vector.broadcast %cst_6 : f32 to vector<64x256xf32>
    %13 = arith.maximumf %11, %12 : vector<64x256xf32>
    %c0_7 = arith.constant 0 : index
    %c0_8 = arith.constant 0 : index
    %14 = vector.load %arg4[%c0_7, %c0_8] : memref<256x256xf32, #tpu.memory_space<vmem>>, vector<256x256xf32>
    %cst_9 = arith.constant dense<0.000000e+00> : vector<64x256xf32>
    %15 = tpu.matmul %13, %14, %cst_9 {dimension_numbers = #tpu.dot_dimension_numbers<[1], [0], [0], [1], [0, 0, 1, 1], [], []>} : vector<64x256xf32>, vector<256x256xf32>, vector<64x256xf32> -> vector<64x256xf32>
    %c0_10 = arith.constant 0 : index
    %c0_11 = arith.constant 0 : index
    %16 = vector.load %arg5[%c0_10, %c0_11] : memref<1x256xf32, #tpu.memory_space<vmem>>, vector<1x256xf32>
    %17 = vector.broadcast %16 : vector<1x256xf32> to vector<64x256xf32>
    %18 = arith.addf %15, %17 : vector<64x256xf32>
    %cst_12 = arith.constant 0.000000e+00 : f32
    %19 = vector.broadcast %cst_12 : f32 to vector<64x256xf32>
    %20 = arith.maximumf %18, %19 : vector<64x256xf32>
    %c0_13 = arith.constant 0 : index
    %c0_14 = arith.constant 0 : index
    %21 = vector.load %arg6[%c0_13, %c0_14] : memref<64x256xf32, #tpu.memory_space<vmem>>, vector<64x256xf32>
    tpu.vector_store %arg6[%c0_13, %c0_14], %20 {strides = array<i32>} : memref<64x256xf32, #tpu.memory_space<vmem>>, vector<64x256xf32>,
    return
  }
  func.func @transform_0(%arg0: i32) -> (i32, i32) {
    %c0_i32 = arith.constant 0 : i32
    %c0_i32_0 = arith.constant 0 : i32
    return %arg0, %c0_i32 : i32, i32
  }
  func.func @transform_1(%arg0: i32) -> (i32, i32) {
    %c0_i32 = arith.constant 0 : i32
    %c0_i32_0 = arith.constant 0 : i32
    %c0_i32_1 = arith.constant 0 : i32
    return %c0_i32, %c0_i32_0 : i32, i32
  }
  func.func @transform_2(%arg0: i32) -> (i32, i32) {
    %c0_i32 = arith.constant 0 : i32
    %c0_i32_0 = arith.constant 0 : i32
    %c0_i32_1 = arith.constant 0 : i32
    return %c0_i32, %c0_i32_0 : i32, i32
  }
  func.func @transform_3(%arg0: i32) -> (i32, i32) {
    %c0_i32 = arith.constant 0 : i32
    %c0_i32_0 = arith.constant 0 : i32
    %c0_i32_1 = arith.constant 0 : i32
    return %c0_i32, %c0_i32_0 : i32, i32
  }
  func.func @transform_4(%arg0: i32) -> (i32, i32) {
    %c0_i32 = arith.constant 0 : i32
    %c0_i32_0 = arith.constant 0 : i32
    %c0_i32_1 = arith.constant 0 : i32
    return %c0_i32, %c0_i32_0 : i32, i32
  }
  func.func @transform_5(%arg0: i32) -> (i32, i32) {
    %c0_i32 = arith.constant 0 : i32
    %c0_i32_0 = arith.constant 0 : i32
    return %arg0, %c0_i32 : i32, i32
  }
}

</mosaic_0001>

<bundles_post_ra>
// kernel: tpu_custom_call.1
= control target key start
LH: loop header
LB: loop body
LE: loop exit
PB: predicated region body
PF: predicated region fallthrough
CT: control target
= control target key end

     0   :  { %10 = vsyncpa [#allocation3], 0  ;;  %s616_s0 = inlined_call_operand.vmem [shape: f32[64,21], index: 0, kind: input, shape index: {}]   ;;  %s617_s1 = inlined_call_operand.vmem [shape: f32[1,256], index: 1, kind: input, shape index: {}]   ;;  %s618_s2 = inlined_call_operand.vmem [shape: f32[1,256], index: 2, kind: input, shape index: {}]   ;;  %s619_s3 = inlined_call_operand.hbm [shape: f32[256,256], index: 3, kind: input, shape index: {}]   ;;  %s620_s4 = inlined_call_operand.vmem [shape: f32[1,256], index: 4, kind: input, shape index: {}]   ;;  %s621_s5 = inlined_call_operand.hbm [shape: f32[64,256], index: 5, kind: output, shape index: {}]  }
   0x1   :  { %11 = vsyncpa [#allocation4], 0  ;;  %s499_s18 = smov [#allocation2]  }
   0x2   :  { %s23_s19 = sshll.u32 %s499_s18, 4  ;;  %s24_s19 = int_to_ptr.vmem [resolvable:$true] %s23_s19 }
   0x3   :  { %s463_s20 = scalar_lea.vmem %s24_s19, 8192  ;;  %p468_p1 = scmp.lt.s32.totalorder %s24_s19, %s24_s19 }
   0x4   :  { %p464_p0 = scmp.ne.s32.totalorder %s24_s19, %s463_s20  ;;  %p469_p2 = scmp.lt.s32.totalorder %s463_s20, %s463_s20 }
   0x6   :  { %p470_p3 = por %p469_p2, %p468_p1 }
   0x8   :  { %p471_p4 = pnand %p470_p3, %p464_p0 }
   0xa   :  { %474 = shalt.err (!%p471_p4)
}
   0xb   :  { %s500_s21 = smov 256   ;;  %s501_s22 = smov 16  }
   0xc   :  { %29 = dma.hbm_to_vmem [thread:$0]  %s619_s3, 8192, %s24_s19, [#allocation3], %s500_s21, %s500_s21, %s501_s22  }
   0xd   :  { %495 = dma.done.wait [#allocation3], 8192  }
   0xe   :  { %496 = vsyncadd [#allocation3], 4294959104  ;;  %vm43_vm0 = vcmask 171008   ;;  %v35_v0 = vld [vmem:[%s616_s0] sm:$0xff]  ;;  %v36_v1 = vld [vmem:[%s616_s0 + $0x8] sm:$0xff] }
   0xf   :  { %v39_v2 = vld [vmem:[%s616_s0 + $0x20] sm:$0xff]  ;;  %v44_v3 = vsel %vm43_vm0, %v35_v0, 0.0  ;;  %v47_v4 = vsel %vm43_vm0, %v36_v1, 0.0  ;;  %v40_v5 = vld [vmem:[%s616_s0 + $0x28] sm:$0xff]  ;;  %v180_v6 = vld [vmem:[#allocation2 + $0xf8] sm:$0xff] }
  0x10   :  { %45 = vadd.xlane.f32.xlu0 %v44_v3  ;;  %48 = vadd.xlane.f32.xlu1 %v47_v4  ;;  %v56_v7 = vsel %vm43_vm0, %v39_v2, 0.0  ;;  %v59_v8 = vsel %vm43_vm0, %v40_v5, 0.0  ;;  %v179_v9 = vld [vmem:[#allocation2 + $0xf0] sm:$0xff]  ;;  %v178_v10 = vld [vmem:[#allocation2 + $0xe8] sm:$0xff]  ;;  %v177_v13 = vld [vmem:[#allocation2 + $0xe0] sm:$0xff] }
  0x11   :  { %225 = vmatprep.subr.mxu0 %v180_v6  ;;  %387 = vmatprep.subr.mxu1 %v180_v6  ;;  %v37_v11 = vld [vmem:[%s616_s0 + $0x10] sm:$0xff]  ;;  %v176_v14 = vld [vmem:[#allocation2 + $0xd8] sm:$0xff]  ;;  %v174_v20 = vld [vmem:[#allocation2 + $0xc8] sm:$0xff] }
  0x12   :  { %v41_v12 = vld [vmem:[%s616_s0 + $0x30] sm:$0xff]  ;;  %226 = vmatpush1.msra.mxu0 %v179_v9  ;;  %419 = vmatpush1.msra.mxu1 %v179_v9  ;;  %v50_v16 = vsel %vm43_vm0, %v37_v11, 0.0  ;;  %v38_v18 = vld [vmem:[%s616_s0 + $0x18] sm:$0xff]  ;;  %v173_v21 = vld [vmem:[#allocation2 + $0xc0] sm:$0xff] }
  0x13   :  { %227 = vmatprep.subr.mxu0 %v178_v10  ;;  %388 = vmatprep.subr.mxu1 %v178_v10  ;;  %v175_v15 = vld [vmem:[#allocation2 + $0xd0] sm:$0xff]  ;;  %v62_v17 = vsel %vm43_vm0, %v41_v12, 0.0  ;;  %v42_v19 = vld [vmem:[%s616_s0 + $0x38] sm:$0xff]  ;;  %v53_v23 = vsel %vm43_vm0, %v38_v18, 0.0  ;;  %v170_v26 = vld [vmem:[#allocation2 + $0xa8] sm:$0xff] }
  0x14   :  { %57 = vadd.xlane.f32.xlu0 %v56_v7  ;;  %60 = vadd.xlane.f32.xlu1 %v59_v8  ;;  %v172_v22 = vld [vmem:[#allocation2 + $0xb8] sm:$0xff]  ;;  %v65_v24 = vsel %vm43_vm0, %v42_v19, 0.0  ;;  %v171_v25 = vld [vmem:[#allocation2 + $0xb0] sm:$0xff]  ;;  %v169_v27 = vld [vmem:[#allocation2 + $0xa0] sm:$0xff] }
  0x15   :  { %228 = vmatpush1.msra.mxu0 %v177_v13  ;;  %420 = vmatpush1.msra.mxu1 %v177_v13  ;;  %v168_v28 = vld [vmem:[#allocation2 + $0x98] sm:$0xff]  ;;  %v167_v29 = vld [vmem:[#allocation2 + $0x90] sm:$0xff]  ;;  %v166_v30 = vld [vmem:[#allocation2 + $0x88] sm:$0xff] }
  0x16   :  { %229 = vmatprep.subr.mxu0 %v176_v14  ;;  %389 = vmatprep.subr.mxu1 %v176_v14  ;;  %v165_v31 = vld [vmem:[#allocation2 + $0x80] sm:$0xff]  ;;  %v164_v32 = vld [vmem:[#allocation2 + $0x78] sm:$0xff]  ;;  %v163_v33 = vld [vmem:[#allocation2 + $0x70] sm:$0xff] }
  0x17   :  { %230 = vmatpush1.msra.mxu0 %v175_v15  ;;  %421 = vmatpush1.msra.mxu1 %v175_v15  ;;  %v162_v34 = vld [vmem:[#allocation2 + $0x68] sm:$0xff]  ;;  %v161_v35 = vld [vmem:[#allocation2 + $0x60] sm:$0xff]  ;;  %v160_v36 = vld [vmem:[#allocation2 + $0x58] sm:$0xff] }
  0x18   :  { %51 = vadd.xlane.f32.xlu0 %v50_v16  ;;  %63 = vadd.xlane.f32.xlu1 %v62_v17  ;;  %v159_v37 = vld [vmem:[#allocation2 + $0x50] sm:$0xff]  ;;  %v158_v38 = vld [vmem:[#allocation2 + $0x48] sm:$0xff]  ;;  %v157_v39 = vld [vmem:[#allocation2 + $0x40] sm:$0xff]  ;;  %v79_v16 = vlaneseq }
  0x19   :  { %231 = vmatprep.subr.mxu0 %v174_v20  ;;  %390 = vmatprep.subr.mxu1 %v174_v20  ;;  %v156_v40 = vld [vmem:[#allocation2 + $0x38] sm:$0xff]  ;;  %v155_v41 = vld [vmem:[#allocation2 + $0x30] sm:$0xff]  ;;  %v154_v42 = vld [vmem:[#allocation2 + $0x28] sm:$0xff] }
  0x1a   :  { %232 = vmatpush1.msra.mxu0 %v173_v21  ;;  %422 = vmatpush1.msra.mxu1 %v173_v21  ;;  %v153_v43 = vld [vmem:[#allocation2 + $0x20] sm:$0xff]  ;;  %v152_v44 = vld [vmem:[#allocation2 + $0x18] sm:$0xff]  ;;  %v151_v45 = vld [vmem:[#allocation2 + $0x10] sm:$0xff]  ;;  %v80_v17 = vshrl.u32 %v79_v16, 7 }
  0x1b   :  { %233 = vmatprep.subr.mxu0 %v172_v22  ;;  %391 = vmatprep.subr.mxu1 %v172_v22  ;;  %v150_v46 = vld [vmem:[#allocation2 + $0x8] sm:$0xff]  ;;  %v149_v47 = vld [vmem:[#allocation2] sm:$0xff]  ;;  %v212_v48 = vld [vmem:[#allocation2 + $0x1f8] sm:$0xff] }
  0x1c   :  { %54 = vadd.xlane.f32.xlu0 %v53_v23  ;;  %66 = vadd.xlane.f32.xlu1 %v65_v24  ;;  %v211_v49 = vld [vmem:[#allocation2 + $0x1f0] sm:$0xff]  ;;  %v210_v50 = vld [vmem:[#allocation2 + $0x1e8] sm:$0xff]  ;;  %v209_v51 = vld [vmem:[#allocation2 + $0x1e0] sm:$0xff]  ;;  %v571_v18 = vsub.s32 0, %v80_v17  ;;  %v573_v19 = vsub.s32 1, %v80_v17 }
  0x1d   :  { %234 = vmatpush1.msra.mxu0 %v171_v25  ;;  %423 = vmatpush1.msra.mxu1 %v171_v25  ;;  %v208_v52 = vld [vmem:[#allocation2 + $0x1d8] sm:$0xff]  ;;  %v207_v53 = vld [vmem:[#allocation2 + $0x1d0] sm:$0xff]  ;;  %v206_v54 = vld [vmem:[#allocation2 + $0x1c8] sm:$0xff] }
  0x1e   :  { %235 = vmatprep.subr.mxu0 %v170_v26  ;;  %392 = vmatprep.subr.mxu1 %v170_v26  ;;  %v205_v55 = vld [vmem:[#allocation2 + $0x1c0] sm:$0xff]  ;;  %v204_v56 = vld [vmem:[#allocation2 + $0x1b8] sm:$0xff]  ;;  %v203_v57 = vld [vmem:[#allocation2 + $0x1b0] sm:$0xff] }
  0x1f   :  { %236 = vmatpush1.msra.mxu0 %v169_v27  ;;  %424 = vmatpush1.msra.mxu1 %v169_v27  ;;  %v202_v58 = vld [vmem:[#allocation2 + $0x1a8] sm:$0xff]  ;;  %v201_v59 = vld [vmem:[#allocation2 + $0x1a0] sm:$0xff]  ;;  %v200_v60 = vld [vmem:[#allocation2 + $0x198] sm:$0xff] }
  0x20   :  { %237 = vmatprep.subr.mxu0 %v168_v28  ;;  %393 = vmatprep.subr.mxu1 %v168_v28  ;;  %v199_v61 = vld [vmem:[#allocation2 + $0x190] sm:$0xff]  ;;  %v198_v62 = vld [vmem:[#allocation2 + $0x188] sm:$0xff]  ;;  %v197_v63 = vld [vmem:[#allocation2 + $0x180] sm:$0xff] }
  0x21   :  { %238 = vmatpush1.msra.mxu0 %v167_v29  ;;  %425 = vmatpush1.msra.mxu1 %v167_v29  ;;  %v196_v0 = vld [vmem:[#allocation2 + $0x178] sm:$0xff]  ;;  %v195_v1 = vld [vmem:[#allocation2 + $0x170] sm:$0xff]  ;;  %v194_v2 = vld [vmem:[#allocation2 + $0x168] sm:$0xff] }
  0x22   :  { %239 = vmatprep.subr.mxu0 %v166_v30  ;;  %394 = vmatprep.subr.mxu1 %v166_v30  ;;  %v193_v3 = vld [vmem:[#allocation2 + $0x160] sm:$0xff]  ;;  %v192_v4 = vld [vmem:[#allocation2 + $0x158] sm:$0xff]  ;;  %v191_v5 = vld [vmem:[#allocation2 + $0x150] sm:$0xff] }
  0x23   :  { %240 = vmatpush1.msra.mxu0 %v165_v31  ;;  %426 = vmatpush1.msra.mxu1 %v165_v31  ;;  %v190_v6 = vld [vmem:[#allocation2 + $0x148] sm:$0xff]  ;;  %v189_v7 = vld [vmem:[#allocation2 + $0x140] sm:$0xff]  ;;  %v188_v8 = vld [vmem:[#allocation2 + $0x138] sm:$0xff] }
  0x24   :  { %241 = vmatprep.subr.mxu0 %v164_v32  ;;  %395 = vmatprep.subr.mxu1 %v164_v32  ;;  %v187_v9 = vld [vmem:[#allocation2 + $0x130] sm:$0xff]  ;;  %v186_v10 = vld [vmem:[#allocation2 + $0x128] sm:$0xff]  ;;  %v185_v11 = vld [vmem:[#allocation2 + $0x120] sm:$0xff] }
  0x25   :  { %242 = vmatpush1.msra.mxu0 %v163_v33  ;;  %427 = vmatpush1.msra.mxu1 %v163_v33  ;;  %v184_v12 = vld [vmem:[#allocation2 + $0x118] sm:$0xff]  ;;  %v183_v13 = vld [vmem:[#allocation2 + $0x110] sm:$0xff]  ;;  %v182_v14 = vld [vmem:[#allocation2 + $0x108] sm:$0xff] }
  0x26   :  { %243 = vmatprep.subr.mxu0 %v162_v34  ;;  %396 = vmatprep.subr.mxu1 %v162_v34  ;;  %v181_v15 = vld [vmem:[#allocation2 + $0x100] sm:$0xff] }
  0x27   :  { %244 = vmatpush1.msra.mxu0 %v161_v35  ;;  %428 = vmatpush1.msra.mxu1 %v161_v35  ;;  %v77_v20 = vld [vmem:[%s617_s1] sm:$0x3] }
  0x28   :  { %245 = vmatprep.subr.mxu0 %v160_v36  ;;  %397 = vmatprep.subr.mxu1 %v160_v36  ;;  %v105_v21 = vld [vmem:[%s618_s2] sm:$0x3]  ;;  %v82_v22 = vrot.slane %v77_v20, %v571_v18  ;;  %v86_v23 = vrot.slane %v77_v20, %v573_v19 }
  0x29   :  { %246 = vmatpush1.msra.mxu0 %v159_v37  ;;  %429 = vmatpush1.msra.mxu1 %v159_v37  ;;  %v584_v28 = vrot.slane %v105_v21, %v571_v18  ;;  %v114_v29 = vrot.slane %v105_v21, %v573_v19 }
  0x2a   :  { %247 = vmatprep.subr.mxu0 %v158_v38  ;;  %398 = vmatprep.subr.mxu1 %v158_v38 }
  0x2b   :  { %248 = vmatpush1.msra.mxu0 %v157_v39  ;;  %430 = vmatpush1.msra.mxu1 %v157_v39 }
  0x2c   :  { %249 = vmatprep.subr.mxu0 %v156_v40  ;;  %399 = vmatprep.subr.mxu1 %v156_v40 }
  0x2d   :  { %250 = vmatpush1.msra.mxu0 %v155_v41  ;;  %431 = vmatpush1.msra.mxu1 %v155_v41 }
  0x2e   :  { %251 = vmatprep.subr.mxu0 %v154_v42  ;;  %400 = vmatprep.subr.mxu1 %v154_v42 }
  0x2f   :  { %252 = vmatpush1.msra.mxu0 %v153_v43  ;;  %432 = vmatpush1.msra.mxu1 %v153_v43 }
  0x30   :  { %253 = vmatprep.subr.mxu0 %v152_v44  ;;  %401 = vmatprep.subr.mxu1 %v152_v44 }
  0x31   :  { %254 = vmatpush1.msra.mxu0 %v151_v45  ;;  %433 = vmatpush1.msra.mxu1 %v151_v45 }
  0x32   :  { %255 = vmatprep.subr.mxu0 %v150_v46  ;;  %402 = vmatprep.subr.mxu1 %v150_v46 }
  0x33   :  { %256 = vmatpush1.msra.mxu0 %v149_v47  ;;  %434 = vmatpush1.msra.mxu1 %v149_v47 }
  0x34   :  { %257 = vmatprep.subr.mxu0 %v212_v48  ;;  %403 = vmatprep.subr.mxu1 %v212_v48 }
  0x35   :  { %258 = vmatpush2.msra.mxu0 %v211_v49  ;;  %435 = vmatpush2.msra.mxu1 %v211_v49 }
  0x36   :  { %259 = vmatprep.subr.mxu0 %v210_v50  ;;  %404 = vmatprep.subr.mxu1 %v210_v50 }
  0x37   :  { %260 = vmatpush2.msra.mxu0 %v209_v51  ;;  %436 = vmatpush2.msra.mxu1 %v209_v51 }
  0x38   :  { %261 = vmatprep.subr.mxu0 %v208_v52  ;;  %405 = vmatprep.subr.mxu1 %v208_v52 }
  0x39   :  { %262 = vmatpush2.msra.mxu0 %v207_v53  ;;  %437 = vmatpush2.msra.mxu1 %v207_v53 }
  0x3a   :  { %263 = vmatprep.subr.mxu0 %v206_v54  ;;  %406 = vmatprep.subr.mxu1 %v206_v54 }
  0x3b   :  { %264 = vmatpush2.msra.mxu0 %v205_v55  ;;  %438 = vmatpush2.msra.mxu1 %v205_v55 }
  0x3c   :  { %265 = vmatprep.subr.mxu0 %v204_v56  ;;  %407 = vmatprep.subr.mxu1 %v204_v56 }
  0x3d   :  { %266 = vmatpush2.msra.mxu0 %v203_v57  ;;  %439 = vmatpush2.msra.mxu1 %v203_v57 }
  0x3e   :  { %267 = vmatprep.subr.mxu0 %v202_v58  ;;  %408 = vmatprep.subr.mxu1 %v202_v58 }
  0x3f   :  { %268 = vmatpush2.msra.mxu0 %v201_v59  ;;  %440 = vmatpush2.msra.mxu1 %v201_v59 }
  0x40   :  { %269 = vmatprep.subr.mxu0 %v200_v60  ;;  %409 = vmatprep.subr.mxu1 %v200_v60 }
  0x41   :  { %270 = vmatpush2.msra.mxu0 %v199_v61  ;;  %441 = vmatpush2.msra.mxu1 %v199_v61 }
  0x42   :  { %271 = vmatprep.subr.mxu0 %v198_v62  ;;  %410 = vmatprep.subr.mxu1 %v198_v62 }
  0x43   :  { %272 = vmatpush2.msra.mxu0 %v197_v63  ;;  %442 = vmatpush2.msra.mxu1 %v197_v63 }
  0x44   :  { %273 = vmatprep.subr.mxu0 %v196_v0  ;;  %411 = vmatprep.subr.mxu1 %v196_v0 }
  0x45   :  { %274 = vmatpush2.msra.mxu0 %v195_v1  ;;  %443 = vmatpush2.msra.mxu1 %v195_v1 }
  0x46   :  { %275 = vmatprep.subr.mxu0 %v194_v2  ;;  %412 = vmatprep.subr.mxu1 %v194_v2 }
  0x47   :  { %276 = vmatpush2.msra.mxu0 %v193_v3  ;;  %444 = vmatpush2.msra.mxu1 %v193_v3 }
  0x48   :  { %277 = vmatprep.subr.mxu0 %v192_v4  ;;  %413 = vmatprep.subr.mxu1 %v192_v4 }
  0x49   :  { %278 = vmatpush2.msra.mxu0 %v191_v5  ;;  %445 = vmatpush2.msra.mxu1 %v191_v5 }
  0x4a   :  { %279 = vmatprep.subr.mxu0 %v190_v6  ;;  %414 = vmatprep.subr.mxu1 %v190_v6 }
  0x4b   :  { %280 = vmatpush2.msra.mxu0 %v189_v7  ;;  %446 = vmatpush2.msra.mxu1 %v189_v7 }
  0x4c   :  { %281 = vmatprep.subr.mxu0 %v188_v8  ;;  %415 = vmatprep.subr.mxu1 %v188_v8 }
  0x4d   :  { %282 = vmatpush2.msra.mxu0 %v187_v9  ;;  %447 = vmatpush2.msra.mxu1 %v187_v9 }
  0x4e   :  { %283 = vmatprep.subr.mxu0 %v186_v10  ;;  %416 = vmatprep.subr.mxu1 %v186_v10 }
  0x4f   :  { %284 = vmatpush2.msra.mxu0 %v185_v11  ;;  %448 = vmatpush2.msra.mxu1 %v185_v11 }
  0x50   :  { %285 = vmatprep.subr.mxu0 %v184_v12  ;;  %417 = vmatprep.subr.mxu1 %v184_v12 }
  0x51   :  { %286 = vmatpush2.msra.mxu0 %v183_v13  ;;  %449 = vmatpush2.msra.mxu1 %v183_v13 }
  0x52   :  { %287 = vmatprep.subr.mxu0 %v182_v14  ;;  %418 = vmatprep.subr.mxu1 %v182_v14 }
  0x53   :  { %288 = vmatpush2.msra.mxu0 %v181_v15  ;;  %450 = vmatpush2.msra.mxu1 %v181_v15 }
  0x99   :  { %v46_v24 = vpop.xlane.xlu0 %45  ;;  %v49_v25 = vpop.xlane.xlu1 %48 }
  0x9a   :  { %v69_v26 = vmul.f32 0.04761905, %v46_v24  ;;  %v70_v27 = vmul.f32 0.04761905, %v49_v25 }
  0x9c   :  { %v89_v30 = vmul.f32 %v82_v22, %v69_v26  ;;  %v91_v31 = vmul.f32 %v82_v22, %v70_v27  ;;  %v92_v32 = vmul.f32 %v86_v23, %v70_v27  ;;  %v90_v33 = vmul.f32 %v86_v23, %v69_v26 }
  0x9d   :  { %v58_v34 = vpop.xlane.xlu0 %57  ;;  %v61_v35 = vpop.xlane.xlu1 %60 }
  0x9e   :  { %v73_v36 = vmul.f32 0.04761905, %v58_v34  ;;  %v74_v37 = vmul.f32 0.04761905, %v61_v35  ;;  %v118_v38 = vadd.f32 %v114_v29, %v90_v33  ;;  %v117_v39 = vadd.f32 %v584_v28, %v89_v30 }
  0x9f   :  { %v120_v40 = vadd.f32 %v114_v29, %v92_v32  ;;  %v119_v41 = vadd.f32 %v584_v28, %v91_v31 }
  0xa0   :  { %v97_v42 = vmul.f32 %v82_v22, %v73_v36  ;;  %v99_v43 = vmul.f32 %v82_v22, %v74_v37  ;;  %v100_v44 = vmul.f32 %v86_v23, %v74_v37  ;;  %v134_v45 = vmax.f32 %v118_v38, 0.0 }
  0xa1   :  { %v52_v46 = vpop.xlane.xlu0 %51  ;;  %v133_v47 = vmax.f32 %v117_v39, 0.0  ;;  %v64_v48 = vpop.xlane.xlu1 %63  ;;  %v136_v49 = vmax.f32 %v120_v40, 0.0  ;;  %v98_v50 = vmul.f32 %v86_v23, %v73_v36  ;;  %v135_v56 = vmax.f32 %v119_v41, 0.0 }
  0xa2   :  { %289 = vmatprep.mubr.f32.mxu0 %v134_v45  ;;  %v71_v51 = vmul.f32 0.04761905, %v52_v46  ;;  %v75_v52 = vmul.f32 0.04761905, %v64_v48  ;;  %v125_v53 = vadd.f32 %v584_v28, %v97_v42  ;;  %v128_v54 = vadd.f32 %v114_v29, %v100_v44 }
  0xa3   :  { %290 = vmatmul.mubr.f32.vlgmr.msra.gmra.mxu0 %v133_v47  ;;  %v126_v55 = vadd.f32 %v114_v29, %v98_v50  ;;  %v127_v57 = vadd.f32 %v584_v28, %v99_v43 }
  0xa4   :  { %v93_v58 = vmul.f32 %v82_v22, %v71_v51  ;;  %v94_v59 = vmul.f32 %v86_v23, %v71_v51  ;;  %v101_v60 = vmul.f32 %v82_v22, %v75_v52  ;;  %v102_v61 = vmul.f32 %v86_v23, %v75_v52  ;;  %295 = vmatprep.mubr.f32.mxu0 %v136_v49 }
  0xa5   :  { %v142_v62 = vmax.f32 %v126_v55, 0.0  ;;  %v55_v63 = vpop.xlane.xlu0 %54  ;;  %v141_v0 = vmax.f32 %v125_v53, 0.0  ;;  %v67_v1 = vpop.xlane.xlu1 %66  ;;  %v144_v2 = vmax.f32 %v128_v54, 0.0  ;;  %v143_v7 = vmax.f32 %v127_v57, 0.0 }
  0xa6   :  { %v72_v3 = vmul.f32 0.04761905, %v55_v63  ;;  %v76_v4 = vmul.f32 0.04761905, %v67_v1  ;;  %v122_v5 = vadd.f32 %v114_v29, %v94_v59  ;;  %v121_v6 = vadd.f32 %v584_v28, %v93_v58 }
  0xa7   :  { %313 = vmatprep.mubr.f32.mxu1 %v142_v62  ;;  %296 = vmatmul.mubr.f32.gmra.mxu0 %v135_v56  ;;  %v130_v8 = vadd.f32 %v114_v29, %v102_v61  ;;  %v129_v9 = vadd.f32 %v584_v28, %v101_v60 }
  0xa8   :  { %v95_v10 = vmul.f32 %v82_v22, %v72_v3  ;;  %v96_v11 = vmul.f32 %v86_v23, %v72_v3  ;;  %314 = vmatmul.mubr.f32.vlgmr.msra.gmra.mxu1 %v141_v0  ;;  %v103_v12 = vmul.f32 %v82_v22, %v76_v4  ;;  %v104_v13 = vmul.f32 %v86_v23, %v76_v4  ;;  %v213_v23 = vld [vmem:[%s620_s4] sm:$0x3]  ;;  %s502_s4 = smov [#allocation5]  }
  0xa9   :  { %319 = vmatprep.mubr.f32.mxu1 %v144_v2  ;;  %v138_v14 = vmax.f32 %v122_v5, 0.0  ;;  %v137_v15 = vmax.f32 %v121_v6, 0.0  ;;  %v146_v16 = vmax.f32 %v130_v8, 0.0  ;;  %v145_v26 = vmax.f32 %v129_v9, 0.0  ;;  %s375_s18 = sshll.u32 %s502_s4, 4  ;;  %s376_s18 = int_to_ptr.vmem [resolvable:$true] %s375_s18 }
  0xaa   :  { %v123_v17 = vadd.f32 %v584_v28, %v95_v10  ;;  %v124_v20 = vadd.f32 %v114_v29, %v96_v11  ;;  %v132_v21 = vadd.f32 %v114_v29, %v104_v13  ;;  %v131_v24 = vadd.f32 %v584_v28, %v103_v12  ;;  %s475_s19 = scalar_lea.vmem %s376_s18, 2048  ;;  %p480_p6 = scmp.lt.s32.totalorder %s376_s18, %s376_s18 }
  0xab   :  { %301 = vmatprep.mubr.f32.mxu0 %v138_v14  ;;  %v218_v29 = vrot.slane %v213_v23, %v571_v18  ;;  %v600_v28 = vrot.slane %v213_v23, %v573_v19  ;;  %p476_p5 = scmp.ne.s32.totalorder %s376_s18, %s475_s19  ;;  %p481_p7 = scmp.lt.s32.totalorder %s475_s19, %s475_s19 }
  0xac   :  { %320 = vmatmul.mubr.f32.gmra.mxu1 %v143_v7  ;;  %302 = vmatmul.mubr.f32.gmra.mxu0 %v137_v15  ;;  %v140_v25 = vmax.f32 %v124_v20, 0.0  ;;  %v139_v27 = vmax.f32 %v123_v17, 0.0  ;;  %v148_v30 = vmax.f32 %v132_v21, 0.0  ;;  %v147_v22 = vmax.f32 %v131_v24, 0.0 }
  0xad   :  { %325 = vmatprep.mubr.f32.mxu1 %v146_v16  ;;  %p482_p8 = por %p481_p7, %p480_p6 }
  0xae   :  { %307 = vmatprep.mubr.f32.mxu0 %v140_v25 }
  0xaf   :  { %p483_p9 = pnand %p482_p8, %p476_p5 }
  0xb0   :  { %326 = vmatmul.mubr.f32.gmra.mxu1 %v145_v26  ;;  %308 = vmatmul.mubr.f32.gmra.mxu0 %v139_v27 }
  0xb1   :  { %331 = vmatprep.mubr.f32.mxu1 %v148_v30 }
  0xb4   :  { %332 = vmatmul.mubr.f32.gmra.mxu1 %v147_v22 }
 0x163   :  { %v291_v31 = vpop.f32.mrf.mxu0 }
 0x164   :  { %v292_v32 = vadd.f32 %v291_v31, %v218_v29 }
 0x165   :  { %v293_v33 = vpop.f32.mrf.mxu0 }
 0x166   :  { %v338_v34 = vmax.f32 %v292_v32, 0.0  ;;  %v294_v35 = vadd.f32 %v293_v33, %v600_v28 }
 0x167   :  { %v297_v36 = vpop.f32.mrf.mxu0 }
 0x168   :  { %354 = vst [vmem:[#allocation5] sm:$0xff] %v338_v34  ;;  %v339_v37 = vmax.f32 %v294_v35, 0.0  ;;  %v298_v38 = vadd.f32 %v297_v36, %v218_v29  ;;  %v315_v39 = vpop.f32.mrf.mxu1 }
 0x169   :  { %v316_v40 = vadd.f32 %v315_v39, %v218_v29  ;;  %v299_v41 = vpop.f32.mrf.mxu0 }
 0x16a   :  { %355 = vst [vmem:[#allocation5 + $0x8] sm:$0xff] %v339_v37  ;;  %v340_v42 = vmax.f32 %v298_v38, 0.0  ;;  %v300_v18 = vadd.f32 %v299_v41, %v600_v28  ;;  %v317_v43 = vpop.f32.mrf.mxu1 }
 0x16b   :  { %v346_v19 = vmax.f32 %v316_v40, 0.0  ;;  %v318_v44 = vadd.f32 %v317_v43, %v600_v28 }
 0x16c   :  { %356 = vst [vmem:[#allocation5 + $0x10] sm:$0xff] %v340_v42  ;;  %v341_v45 = vmax.f32 %v300_v18, 0.0  ;;  %v321_v46 = vpop.f32.mrf.mxu1  ;;  %v303_v47 = vpop.f32.mrf.mxu0 }
 0x16d   :  { %362 = vst [vmem:[#allocation5 + $0x40] sm:$0xff] %v346_v19  ;;  %v347_v48 = vmax.f32 %v318_v44, 0.0  ;;  %v322_v49 = vadd.f32 %v321_v46, %v218_v29  ;;  %v304_v50 = vadd.f32 %v303_v47, %v218_v29 }
 0x16e   :  { %357 = vst [vmem:[#allocation5 + $0x18] sm:$0xff] %v341_v45  ;;  %v323_v51 = vpop.f32.mrf.mxu1  ;;  %v305_v52 = vpop.f32.mrf.mxu0 }
 0x16f   :  { %363 = vst [vmem:[#allocation5 + $0x48] sm:$0xff] %v347_v48  ;;  %v348_v53 = vmax.f32 %v322_v49, 0.0  ;;  %v342_v54 = vmax.f32 %v304_v50, 0.0  ;;  %v324_v55 = vadd.f32 %v323_v51, %v600_v28  ;;  %v306_v56 = vadd.f32 %v305_v52, %v600_v28 }
 0x170   :  { %v327_v57 = vpop.f32.mrf.mxu1  ;;  %v309_v58 = vpop.f32.mrf.mxu0 }
 0x171   :  { %364 = vst [vmem:[#allocation5 + $0x50] sm:$0xff] %v348_v53  ;;  %358 = vst [vmem:[#allocation5 + $0x20] sm:$0xff] %v342_v54  ;;  %v349_v59 = vmax.f32 %v324_v55, 0.0  ;;  %v343_v60 = vmax.f32 %v306_v56, 0.0  ;;  %v328_v61 = vadd.f32 %v327_v57, %v218_v29  ;;  %v310_v62 = vadd.f32 %v309_v58, %v218_v29 }
 0x172   :  { %v329_v63 = vpop.f32.mrf.mxu1  ;;  %v311_v0 = vpop.f32.mrf.mxu0 }
 0x173   :  { %365 = vst [vmem:[#allocation5 + $0x58] sm:$0xff] %v349_v59  ;;  %359 = vst [vmem:[#allocation5 + $0x28] sm:$0xff] %v343_v60  ;;  %v350_v1 = vmax.f32 %v328_v61, 0.0  ;;  %v344_v2 = vmax.f32 %v310_v62, 0.0  ;;  %v330_v3 = vadd.f32 %v329_v63, %v600_v28  ;;  %v312_v4 = vadd.f32 %v311_v0, %v600_v28 }
 0x174   :  { %v333_v5 = vpop.f32.mrf.mxu1 }
 0x175   :  { %366 = vst [vmem:[#allocation5 + $0x60] sm:$0xff] %v350_v1  ;;  %360 = vst [vmem:[#allocation5 + $0x30] sm:$0xff] %v344_v2  ;;  %v351_v6 = vmax.f32 %v330_v3, 0.0  ;;  %v345_v7 = vmax.f32 %v312_v4, 0.0  ;;  %v334_v8 = vadd.f32 %v333_v5, %v218_v29 }
 0x176   :  { %v335_v9 = vpop.f32.mrf.mxu1 }
 0x177   :  { %367 = vst [vmem:[#allocation5 + $0x68] sm:$0xff] %v351_v6  ;;  %361 = vst [vmem:[#allocation5 + $0x38] sm:$0xff] %v345_v7  ;;  %v352_v10 = vmax.f32 %v334_v8, 0.0  ;;  %v336_v11 = vadd.f32 %v335_v9, %v600_v28 }
 0x179   :  { %368 = vst [vmem:[#allocation5 + $0x70] sm:$0xff] %v352_v10  ;;  %v353_v12 = vmax.f32 %v336_v11, 0.0 }
 0x17b   :  { %369 = vst [vmem:[#allocation5 + $0x78] sm:$0xff] %v353_v12 }
 0x17c   :  { %486 = shalt.err (!%p483_p9)
}
 0x17d   :  { %381 = dma.vmem_to_hbm [thread:$0]  %s376_s18, 2048, %s621_s5, [#allocation4], %s500_s21, %s500_s21, %s501_s22  }
 0x17e   :  { %497 = dma.done.wait [#allocation4], 2048  }
 0x17f   :  { %498 = vsyncadd [#allocation4], 4294965248 }
 0x180   :  { %385 = vsyncpa [#allocation3], 1 }
 0x181   :  { %386 = vsyncpa [#allocation4], 1 }

</bundles_post_ra>
